<compile_context>
chip_gen: v7x
topology: tpu7x:2x2x1
jax: 0.10.0
libtpu: 0.0.40
codegen_flags: <defaults>
</compile_context>

<pallas_src>
import functools

import jax
import jax.numpy as jnp
from jax.experimental import pallas as pl
from jax.experimental.pallas import tpu as pltpu

EPS = 1e-5          # GroupNorm default eps
NUM_GROUPS = 4      # batchNorm2d -> nn.GroupNorm(4, ...)
KH = KW = 4         # conv-transpose kernel size (output is 4x4)


def _round_up(x, m):
    return ((x + m - 1) // m) * m


def _spectral_sigma(weight_4d, n_iter=30):
    """Spectral norm of the ConvTranspose2d weight, PyTorch semantics (dim=1).

    PyTorch's spectral_norm uses dim=1 for ConvTranspose2d, i.e. it flattens
    weight.permute(1,0,2,3) to (out_ch, nz*kh*kw).
    """
    c2 = weight_4d.shape[1]
    w_mat = jnp.transpose(weight_4d, (1, 0, 2, 3)).reshape(c2, -1)
    w_mat = w_mat.astype(jnp.float32)
    u = jax.random.normal(jax.random.PRNGKey(0), (c2,), jnp.float32)
    u = u / (jnp.linalg.norm(u) + 1e-12)
    v = jnp.zeros((w_mat.shape[1],), jnp.float32)
    for _ in range(n_iter):  # deterministic, converged power iteration
        v = w_mat.T @ u
        v = v / (jnp.linalg.norm(v) + 1e-12)
        u = w_mat @ v
        u = u / (jnp.linalg.norm(u) + 1e-12)
    return u @ (w_mat @ v)


def prepare_init_layer_params(weight_4d, gamma, beta, *, channel):
    """One-time parameter prep (mirrors PyTorch's persistent module buffers).

    Packs the raw (un-normalized) weight into the GLU-pair layout
    [g0 | g2 | g1 | g3] with each group lane-padded to `gp` (multiple of 128),
    casts it to bf16 (halves weight HBM->VMEM traffic), and caches 1/sigma.
    """
    nz, c2 = weight_4d.shape[0], weight_4d.shape[1]
    assert c2 == 2 * channel and weight_4d.shape[2:] == (KH, KW)
    assert c2 % NUM_GROUPS == 0, "GroupNorm(4, 2C) requires channel % 2 == 0"
    ch_per_group = c2 // NUM_GROUPS
    n = ch_per_group * KH * KW              # valid columns per group
    gp = max(_round_up(n, 128), 128)        # lane-padded group width

    inv_sigma = 1.0 / _spectral_sigma(weight_4d)

    # Flatten to (nz, K); column index = c*16 + i*4 + j.  Group g is the
    # contiguous column span [g*n, (g+1)*n).
    w_flat = weight_4d.reshape(nz, c2 * KH * KW).astype(jnp.float32)

    def w_group(g):
        return jnp.pad(w_flat[:, g * n:(g + 1) * n], ((0, 0), (0, gp - n)))

    # GLU pairs group 0 with 2 and group 1 with 3 -> pack as [g0|g2|g1|g3].
    w_packed = jnp.concatenate(
        [w_group(0), w_group(2), w_group(1), w_group(3)], axis=1
    ).astype(jnp.bfloat16)

    gamma_flat = jnp.repeat(gamma.astype(jnp.float32), KH * KW)
    beta_flat = jnp.repeat(beta.astype(jnp.float32), KH * KW)

    def a_group(vec, g):
        return jnp.pad(vec[g * n:(g + 1) * n], (0, gp - n))

    gamma_packed = jnp.concatenate(
        [a_group(gamma_flat, g) for g in (0, 2, 1, 3)]).reshape(1, 4 * gp)
    beta_packed = jnp.concatenate(
        [a_group(beta_flat, g) for g in (0, 2, 1, 3)]).reshape(1, 4 * gp)

    return dict(w_packed=w_packed, gamma_packed=gamma_packed,
                beta_packed=beta_packed, inv_sigma=inv_sigma,
                gp=gp, n=n, nz=nz, channel=channel)


def _init_layer_kernel(noise_ref, w_ref, gamma_ref, beta_ref, out_ref,
                       *, gp, inv_n):
    """One GLU pair per grid step: a-group and its paired b-group."""
    # Conv-transpose (1x1 spatial input, stride 1, pad 0) == matmul on MXU.
    # bf16 x bf16 inputs, f32 accumulator.
    y = jnp.dot(noise_ref[...], w_ref[...],
                preferred_element_type=jnp.float32)          # (B, 2*gp) f32

    ya = y[:, :gp]          # a-group (lane-aligned slice)
    yb = y[:, gp:]          # paired b-group

    # GroupNorm stats via lane-aligned reductions (XLU); pad columns are exact
    # zeros so the sums are unaffected -- divide by the true group size.
    def stats(t):
        s = jnp.sum(t, axis=-1, keepdims=True)
        sq = jnp.sum(t * t, axis=-1, keepdims=True)
        mean = s * inv_n
        var = sq * inv_n - mean * mean
        return mean, jax.lax.rsqrt(var + EPS)

    mean_a, rstd_a = stats(ya)
    mean_b, rstd_b = stats(yb)

    ga = gamma_ref[:, :gp]
    ba = beta_ref[:, :gp]
    gb = gamma_ref[:, gp:]
    bb = beta_ref[:, gp:]

    # Folded affine: (y - mean) * (rstd * gamma) + beta, kept in f32 on-chip
    # (v5e VPU/EUP have no bf16 path).  The two half-streams are independent so
    # the b-half sigmoid (EUP) can co-issue with the a-half VPU work.
    a = (ya - mean_a) * (rstd_a * ga) + ba
    b = (yb - mean_b) * (rstd_b * gb) + bb
    out_ref[...] = (a * jax.nn.sigmoid(b)).astype(out_ref.dtype)


def init_layer_forward(noise, params):
    """noise: (B, nz) -> (B, channel, 4, 4) float32 (NCHW)."""
    B, nz = noise.shape
    assert nz == params["nz"]
    channel, gp, n = params["channel"], params["gp"], params["n"]

    # Fold 1/sigma into the tiny noise matrix instead of rescaling W in HBM,
    # and feed the MXU bf16 operands.
    noise_s = (noise.astype(jnp.float32) * params["inv_sigma"]
               ).astype(jnp.bfloat16)

    kernel = functools.partial(_init_layer_kernel, gp=gp, inv_n=1.0 / n)

    out_packed = pl.pallas_call(
        kernel,
        out_shape=jax.ShapeDtypeStruct((B, 2 * gp), jnp.float32),
        grid_spec=pltpu.PrefetchScalarGridSpec(
            num_scalar_prefetch=0,
            grid=(2,),  # one GLU pair (a-group + its b-group) per step
            in_specs=[
                pl.BlockSpec((B, nz), lambda p: (0, 0)),
                pl.BlockSpec((nz, 2 * gp), lambda p: (0, p)),
                pl.BlockSpec((1, 2 * gp), lambda p: (0, p)),
                pl.BlockSpec((1, 2 * gp), lambda p: (0, p)),
            ],
            out_specs=pl.BlockSpec((B, gp), lambda p: (0, p)),
        ),
        compiler_params=pltpu.CompilerParams(
            dimension_semantics=("parallel",)),  # v7x: split pairs across TCs
    )(noise_s, params["w_packed"], params["gamma_packed"],
      params["beta_packed"])

    # Strip lane padding and restore NCHW.
    a = out_packed[:, :n]            # GLU channels [0, channel/2)
    b = out_packed[:, gp:gp + n]     # GLU channels [channel/2, channel)
    return jnp.concatenate([a, b], axis=1).reshape(B, channel, KH, KW)


def init_layer_reference(noise, weight_4d, gamma, beta, *, channel,
                         match_kernel_precision=False):
    """Pure-JAX reference matching PyTorch semantics (f32 path)."""
    B, nz = noise.shape
    c2 = 2 * channel
    inv_sigma = 1.0 / _spectral_sigma(weight_4d)
    w_flat = weight_4d.reshape(nz, -1).astype(jnp.float32)
    noise_f = noise.astype(jnp.float32) * inv_sigma
    if match_kernel_precision:   # emulate the kernel's bf16 operand storage
        w_flat = w_flat.astype(jnp.bfloat16).astype(jnp.float32)
        noise_f = noise_f.astype(jnp.bfloat16).astype(jnp.float32)
    y = (noise_f @ w_flat).reshape(B, c2, KH, KW)
    yg = y.reshape(B, NUM_GROUPS, -1)
    mean = yg.mean(-1, keepdims=True)
    var = yg.var(-1, keepdims=True)
    yn = ((yg - mean) * jax.lax.rsqrt(var + EPS)).reshape(B, c2, KH, KW)
    yn = yn * gamma[None, :, None, None] + beta[None, :, None, None]
    a, b = yn[:, :channel], yn[:, channel:]
    return a * jax.nn.sigmoid(b)


if __name__ == "__main__":
    B, nz, channel = 2, 32, 4     # noise (2, 32) -> output (2, 4, 4, 4)
    c2 = 2 * channel

    key = jax.random.PRNGKey(0)
    k_noise, k_w = jax.random.split(key)
    noise = jax.random.normal(k_noise, (B, nz), dtype=jnp.float32)
    weight = 0.1 * jax.random.normal(k_w, (nz, c2, KH, KW), dtype=jnp.float32)
    gamma = jnp.ones((c2,), jnp.float32)   # GroupNorm default affine init
    beta = jnp.zeros((c2,), jnp.float32)

    params = prepare_init_layer_params(weight, gamma, beta, channel=channel)
    out = init_layer_forward(noise, params)
    out = jax.block_until_ready(out)
    assert out.shape == (B, channel, KH, KW), out.shape

    # Tight check against a reference using the same bf16 operand rounding.
    ref_matched = init_layer_reference(noise, weight, gamma, beta,
                                       channel=channel,
                                       match_kernel_precision=True)
    assert jnp.allclose(out, ref_matched, atol=2e-3, rtol=2e-3), \
        float(jnp.max(jnp.abs(out - ref_matched)))

    # Loose check against the full-f32 PyTorch-semantics reference.
    ref_f32 = init_layer_reference(noise, weight, gamma, beta, channel=channel)
    assert jnp.allclose(out, ref_f32, atol=1e-1, rtol=1e-1), \
        float(jnp.max(jnp.abs(out - ref_f32)))

    print("KERNEL_OK")
</pallas_src>

<mosaic_0001>
module attributes {stable_mosaic.version = 11 : i64} {
  func.func @_init_layer_kernel(%arg0: i32, %arg1: memref<2x32xbf16, #tpu.memory_space<vmem>>, %arg2: memref<32x256xbf16, #tpu.memory_space<vmem>>, %arg3: memref<1x256xf32, #tpu.memory_space<vmem>>, %arg4: memref<1x256xf32, #tpu.memory_space<vmem>>, %arg5: memref<2x128xf32, #tpu.memory_space<vmem>>) attributes {dimension_semantics = [#tpu.dimension_semantics<parallel>], iteration_bounds = array<i64: 2>, scalar_prefetch = 0 : i64, scratch_operands = 0 : i64, tpu.core_type = #tpu.core_type<tc>, window_params = [{pipeline_mode = #tpu.pipeline_mode<synchronous>, transform_indices = @transform_0, window_bounds = array<i64: 2, 32>}, {transform_indices = @transform_1, window_bounds = array<i64: 32, 256>}, {transform_indices = @transform_2, window_bounds = array<i64: 1, 256>}, {transform_indices = @transform_3, window_bounds = array<i64: 1, 256>}, {transform_indices = @transform_4, window_bounds = array<i64: 2, 128>}]} {
    %c0 = arith.constant 0 : index
    %c0_0 = arith.constant 0 : index
    %0 = vector.load %arg1[%c0, %c0_0] : memref<2x32xbf16, #tpu.memory_space<vmem>>, vector<2x32xbf16>
    %c0_1 = arith.constant 0 : index
    %c0_2 = arith.constant 0 : index
    %1 = vector.load %arg2[%c0_1, %c0_2] : memref<32x256xbf16, #tpu.memory_space<vmem>>, vector<32x256xbf16>
    %cst = arith.constant dense<0.000000e+00> : vector<2x256xf32>
    %2 = tpu.matmul %0, %1, %cst {dimension_numbers = #tpu.dot_dimension_numbers<[1], [0], [0], [1], [0, 0, 1, 1], [], []>} : vector<2x32xbf16>, vector<32x256xbf16>, vector<2x256xf32> -> vector<2x256xf32>
    %3 = vector.extract_strided_slice %2 {offsets = [0, 0], sizes = [2, 128], strides = [1, 1]} : vector<2x256xf32> to vector<2x128xf32>
    %4 = vector.extract_strided_slice %2 {offsets = [0, 128], sizes = [2, 128], strides = [1, 1]} : vector<2x256xf32> to vector<2x128xf32>
    %cst_3 = arith.constant dense<0.000000e+00> : vector<2xf32>
    %5 = vector.multi_reduction <add>, %3, %cst_3 [1] : vector<2x128xf32> to vector<2xf32>
    %6 = vector.shape_cast %5 : vector<2xf32> to vector<2x1xf32>
    %7 = arith.mulf %3, %3 : vector<2x128xf32>
    %cst_4 = arith.constant dense<0.000000e+00> : vector<2xf32>
    %8 = vector.multi_reduction <add>, %7, %cst_4 [1] : vector<2x128xf32> to vector<2xf32>
    %9 = vector.shape_cast %8 : vector<2xf32> to vector<2x1xf32>
    %cst_5 = arith.constant 3.125000e-02 : f32
    %10 = vector.broadcast %cst_5 : f32 to vector<2x1xf32>
    %11 = arith.mulf %6, %10 : vector<2x1xf32>
    %cst_6 = arith.constant 3.125000e-02 : f32
    %12 = vector.broadcast %cst_6 : f32 to vector<2x1xf32>
    %13 = arith.mulf %9, %12 : vector<2x1xf32>
    %14 = arith.mulf %11, %11 : vector<2x1xf32>
    %15 = arith.subf %13, %14 : vector<2x1xf32>
    %cst_7 = arith.constant 9.99999974E-6 : f32
    %16 = vector.broadcast %cst_7 : f32 to vector<2x1xf32>
    %17 = arith.addf %15, %16 : vector<2x1xf32>
    %18 = math.rsqrt %17 : vector<2x1xf32>
    %cst_8 = arith.constant dense<0.000000e+00> : vector<2xf32>
    %19 = vector.multi_reduction <add>, %4, %cst_8 [1] : vector<2x128xf32> to vector<2xf32>
    %20 = vector.shape_cast %19 : vector<2xf32> to vector<2x1xf32>
    %21 = arith.mulf %4, %4 : vector<2x128xf32>
    %cst_9 = arith.constant dense<0.000000e+00> : vector<2xf32>
    %22 = vector.multi_reduction <add>, %21, %cst_9 [1] : vector<2x128xf32> to vector<2xf32>
    %23 = vector.shape_cast %22 : vector<2xf32> to vector<2x1xf32>
    %cst_10 = arith.constant 3.125000e-02 : f32
    %24 = vector.broadcast %cst_10 : f32 to vector<2x1xf32>
    %25 = arith.mulf %20, %24 : vector<2x1xf32>
    %cst_11 = arith.constant 3.125000e-02 : f32
    %26 = vector.broadcast %cst_11 : f32 to vector<2x1xf32>
    %27 = arith.mulf %23, %26 : vector<2x1xf32>
    %28 = arith.mulf %25, %25 : vector<2x1xf32>
    %29 = arith.subf %27, %28 : vector<2x1xf32>
    %cst_12 = arith.constant 9.99999974E-6 : f32
    %30 = vector.broadcast %cst_12 : f32 to vector<2x1xf32>
    %31 = arith.addf %29, %30 : vector<2x1xf32>
    %32 = math.rsqrt %31 : vector<2x1xf32>
    %c0_13 = arith.constant 0 : index
    %c0_14 = arith.constant 0 : index
    %33 = vector.load %arg3[%c0_13, %c0_14] : memref<1x256xf32, #tpu.memory_space<vmem>>, vector<1x128xf32>
    %c0_15 = arith.constant 0 : index
    %c0_16 = arith.constant 0 : index
    %34 = vector.load %arg4[%c0_15, %c0_16] : memref<1x256xf32, #tpu.memory_space<vmem>>, vector<1x128xf32>
    %c0_17 = arith.constant 0 : index
    %c128 = arith.constant 128 : index
    %35 = vector.load %arg3[%c0_17, %c128] : memref<1x256xf32, #tpu.memory_space<vmem>>, vector<1x128xf32>
    %c0_18 = arith.constant 0 : index
    %c128_19 = arith.constant 128 : index
    %36 = vector.load %arg4[%c0_18, %c128_19] : memref<1x256xf32, #tpu.memory_space<vmem>>, vector<1x128xf32>
    %37 = vector.broadcast %11 : vector<2x1xf32> to vector<2x128xf32>
    %38 = arith.subf %3, %37 : vector<2x128xf32>
    %39 = vector.broadcast %18 : vector<2x1xf32> to vector<2x128xf32>
    %40 = vector.broadcast %33 : vector<1x128xf32> to vector<2x128xf32>
    %41 = arith.mulf %39, %40 : vector<2x128xf32>
    %42 = arith.mulf %38, %41 : vector<2x128xf32>
    %43 = vector.broadcast %34 : vector<1x128xf32> to vector<2x128xf32>
    %44 = arith.addf %42, %43 : vector<2x128xf32>
    %45 = vector.broadcast %25 : vector<2x1xf32> to vector<2x128xf32>
    %46 = arith.subf %4, %45 : vector<2x128xf32>
    %47 = vector.broadcast %32 : vector<2x1xf32> to vector<2x128xf32>
    %48 = vector.broadcast %35 : vector<1x128xf32> to vector<2x128xf32>
    %49 = arith.mulf %47, %48 : vector<2x128xf32>
    %50 = arith.mulf %46, %49 : vector<2x128xf32>
    %51 = vector.broadcast %36 : vector<1x128xf32> to vector<2x128xf32>
    %52 = arith.addf %50, %51 : vector<2x128xf32>
    %53 = arith.negf %52 : vector<2x128xf32>
    %54 = math.exp %53 : vector<2x128xf32>
    %cst_20 = arith.constant 1.000000e+00 : f32
    %55 = vector.broadcast %cst_20 : f32 to vector<2x128xf32>
    %56 = arith.addf %55, %54 : vector<2x128xf32>
    %57 = arith.divf %55, %56 : vector<2x128xf32>
    %58 = arith.mulf %44, %57 : vector<2x128xf32>
    %c0_21 = arith.constant 0 : index
    %c0_22 = arith.constant 0 : index
    %59 = vector.load %arg5[%c0_21, %c0_22] : memref<2x128xf32, #tpu.memory_space<vmem>>, vector<2x128xf32>
    tpu.vector_store %arg5[%c0_21, %c0_22], %58 {strides = array<i32>} : memref<2x128xf32, #tpu.memory_space<vmem>>, vector<2x128xf32>,
    return
  }
  func.func @transform_0(%arg0: i32) -> (i32, i32) {
    %c0_i32 = arith.constant 0 : i32
    %c0_i32_0 = arith.constant 0 : i32
    %c0_i32_1 = arith.constant 0 : i32
    return %c0_i32, %c0_i32_0 : i32, i32
  }
  func.func @transform_1(%arg0: i32) -> (i32, i32) {
    %c0_i32 = arith.constant 0 : i32
    %c0_i32_0 = arith.constant 0 : i32
    return %c0_i32, %arg0 : i32, i32
  }
  func.func @transform_2(%arg0: i32) -> (i32, i32) {
    %c0_i32 = arith.constant 0 : i32
    %c0_i32_0 = arith.constant 0 : i32
    return %c0_i32, %arg0 : i32, i32
  }
  func.func @transform_3(%arg0: i32) -> (i32, i32) {
    %c0_i32 = arith.constant 0 : i32
    %c0_i32_0 = arith.constant 0 : i32
    return %c0_i32, %arg0 : i32, i32
  }
  func.func @transform_4(%arg0: i32) -> (i32, i32) {
    %c0_i32 = arith.constant 0 : i32
    %c0_i32_0 = arith.constant 0 : i32
    return %c0_i32, %arg0 : i32, i32
  }
}

</mosaic_0001>

<bundles_post_ra>
// kernel: tpu_custom_call.1
= control target key start
LH: loop header
LB: loop body
LE: loop exit
PB: predicated region body
PF: predicated region fallthrough
CT: control target
= control target key end

     0   :  { %9 = vsyncpa [#allocation3], 0  ;;  %s993_s0 = inlined_call_operand.hbm [shape: bf16[2,32], index: 0, kind: input, shape index: {}]   ;;  %s994_s1 = inlined_call_operand.hbm [shape: bf16[32,512], index: 1, kind: input, shape index: {}]   ;;  %s995_s2 = inlined_call_operand.vmem [shape: f32[1,512], index: 2, kind: input, shape index: {}]   ;;  %s996_s3 = inlined_call_operand.vmem [shape: f32[1,512], index: 3, kind: input, shape index: {}]   ;;  %s997_s4 = inlined_call_operand.hbm [shape: f32[2,256], index: 4, kind: output, shape index: {}]  }
   0x1   :  { %10 = vsyncpa [#allocation6], 0 }
   0x2   :  { %12 = vsyncpa [#allocation6 + $0x1], 0 }
   0x3   :  { %13 = vsyncpa [#allocation4], 0 }
   0x4   :  { %15 = vsyncpa [#allocation4 + $0x1], 0  ;;  %s789_s15 = smov 0   ;;  %s791_s16 = smov 0  }
   0x5   :  { %s793_s17 = smov 0   ;;  %s795_s18 = smov 0  }
   0x6 LB: > { %s810_s19 = sadd.s32 4294967295, %s755_s18   ;;  %s524_s20 = sadd.s32 4294967294, %s755_s18   ;;  %s755_s18 = sphi %s795_s18, %s1022_s18   ;;  %s751_s17 = sphi %s793_s17, %s1021_s17   ;;  %s747_s16 = sphi %s791_s16, %s1020_s16   ;;  %s743_s15 = sphi %s789_s15, %s1019_s15  }
   0x7   : > { %s814_s21 = sadd.s32 1, %s755_s18   ;;  %s49_s22 = sadd.s32 1, %s751_s17 }
   0x8   : > { %s46_s23 = ssub.s32 %s755_s18, %s814_s21  ;;  %p56_p0 = scmp.ne.s32.totalorder %s751_s17, %s747_s16 }
   0x9   : > { %p47_p1 = scmp.eq.s32.totalorder %s46_s23, 0  ;;  %p57_p2 = scmp.eq.s32.totalorder %s755_s18, 0 }
   0xa   : > { %p62_p3 = scmp.ne.s32.totalorder %s747_s16, %s743_s15  ;;  %p998_p4 = scmp.eq.s32.totalorder %s810_s19, 0 }
   0xb   : > { %s826_s24 = scalar_select %p47_p1, %s751_s17, %s49_s22  }
   0xc   : > { %p828_p5 = por %p57_p2, %p56_p0  ;;  %p834_p6 = por %p998_p4, %p62_p3 }
   0xd   : > { %p138_p7 = scmp.eq.s32.totalorder %s810_s19, 1  ;;  %p144_p8 = scmp.eq.s32.totalorder %s524_s20, 1 }
   0xe   : > { %s1004_s26 = scalar_select %p834_p6, 1, 0 }
   0xf   : > { %p525_p9 = scmp.ge.s32.totalorder %s755_s18, 1  ;;  %p151_p10 = scmp.lt.s32.totalorder %s755_s18, 3 }
  0x10   : > { %p841_p11 = por %p138_p7, %p56_p0  ;;  %p845_p12 = por %p144_p8, %p62_p3 }
  0x11   : > { %p849_p13 = pnand %p525_p9, %p151_p10  ;;  %s757_s30 = smov [#allocation2]  }
  0x12   : > { %s1005_s27 = scalar_select %p841_p11, 1, 0 }
  0x13   : > { %s1006_s28 = scalar_select %p845_p12, 1, 0 }
  0x14   : > { %s1007_s29 = scalar_select %p849_p13, 1, 0 }
  0x15   : > { %p560_p2 = pneg %p849_p13  ;;  %s164_s5 = sshll.u32 %s757_s30, 4  ;;  %s165_s5 = int_to_ptr.vmem [resolvable:$true] %s164_s5 }
  0x16   : > { %p573_p4 = scmp.lt.s32.totalorder %s755_s18, 2  ;;  %p1008_p0 = scmp.eq.s32.totalorder %s810_s19, 0 }
  0x17   : > { %s175_s7 = sand.u32 1, %s751_s17   ;;  %s627_s12 = scalar_lea.hbm %s993_s0, 16 }
  0x18   : > { %p859_p7 = pnand %p560_p2, %p1008_p0  ;;  %p866_p3 = pnand %p573_p4, %p828_p5 }
  0x19   : > { %s528_s9 = sshll.u32 %s175_s7, 5  ;;  %p628_p8 = scmp.ne.s32.totalorder %s993_s0, %s627_s12 }
  0x1a   : > { %s1010_s8 = scalar_select %p866_p3, 1, 0 }
  0x1b   : > { %p629_p9 = pneg %p859_p7  ;;  %p634_p4 = scmp.lt.u32.totalorder %s627_s12, %s993_s0 }
  0x1d   : > { %p630_p10 = pnand %p629_p9, %p628_p8 }
  0x1f   : > { %p631_p2 = pneg %p630_p10 }
  0x21   : > { %p636_p5 = pnand %p634_p4, %p631_p2 }
  0x23   : > { %639 = shalt.err (!%p636_p5)
}
  0x24   : > { %s640_s23 = scalar_lea.vmem %s165_s5, 16  ;;  %s647_s25 = scalar_lea.vmem %s165_s5, 32 }
  0x25   : > { %p641_p0 = scmp.ne.s32.totalorder %s165_s5, %s640_s23  ;;  %p648_p11 = scmp.lt.s32.totalorder %s165_s5, %s165_s5 }
  0x26   : > { %p649_p6 = scmp.lt.s32.totalorder %s647_s25, %s640_s23 }
  0x27   : > { %p643_p1 = pnand %p641_p0, %p629_p9 }
  0x28   : > { %p650_p13 = por %p649_p6, %p648_p11 }
  0x29   : > { %p644_p12 = pneg %p643_p1 }
  0x2b   : > { %p651_p3 = pnand %p650_p13, %p644_p12 }
  0x2d   : > { %654 = shalt.err (!%p651_p3)
}
  0x2e   : > { %563 = dma.hbm_to_vmem [thread:$0]  (!%p859_p7), %s993_s0, 16, %s165_s5, [#allocation3]  }
  0x2f   : > { %s551_s11 = sshll.u32 %s755_s18, 7  ;;  %s179_s12 = scalar_lea.vmem [#allocation5], %s528_s9 }
  0x30   : > { %s186_s13 = sshll.u32 %s179_s12, 4  ;;  %s890_s22 = scalar_lea.hbm %s994_s1, %s551_s11  ;;  %s892_s13 = int_to_ptr.vmem [resolvable:$true] %s186_s13 }
  0x31   : > { %s894_s6 = scalar_lea.sflag [#allocation6], %s175_s7  ;;  %s655_s23 = scalar_lea.hbm %s890_s22, 512 }
  0x32   : > { %p656_p6 = scmp.ne.s32.totalorder %s890_s22, %s655_s23  ;;  %p1011_p11 = scmp.ne.s32.totalorder %s1010_s8, 0 }
  0x33   : > { %s660_s25 = scalar_lea.hbm %s994_s1, 1024  ;;  %p661_p7 = scmp.lt.u32.totalorder %s890_s22, %s994_s1 }
  0x34   : > { %p657_p12 = pneg %p1011_p11  ;;  %p662_p3 = scmp.lt.u32.totalorder %s660_s25, %s655_s23 }
  0x35   : > { %p664_p9 = scmp.lt.u32.totalorder %s655_s23, %s890_s22 }
  0x36   : > { %p658_p13 = pnand %p657_p12, %p656_p6  ;;  %p663_p8 = por %p662_p3, %p661_p7 }
  0x38   : > { %p659_p1 = pneg %p658_p13  ;;  %p665_p10 = por %p664_p9, %p663_p8 }
  0x3a   : > { %p666_p2 = pnand %p665_p10, %p659_p1 }
  0x3c   : > { %669 = shalt.err (!%p666_p2)
}
  0x3d   : > { %s670_s7 = scalar_lea.vmem %s892_s13, 512  ;;  %s758_s11 = smov [#allocation5]  }
  0x3e   : > { %p671_p4 = scmp.ne.s32.totalorder %s892_s13, %s670_s7  ;;  %s675_s12 = sshll.u32 %s758_s11, 4  ;;  %s676_s12 = int_to_ptr.vmem [resolvable:$false] %s675_s12 }
  0x3f   : > { %s677_s14 = scalar_lea.vmem %s676_s12, 1024  ;;  %p678_p6 = scmp.lt.s32.totalorder %s892_s13, %s676_s12 }
  0x40   : > { %p673_p5 = pnand %p671_p4, %p657_p12  ;;  %p679_p13 = scmp.lt.s32.totalorder %s677_s14, %s670_s7 }
  0x42   : > { %p674_p0 = pneg %p673_p5  ;;  %p680_p7 = por %p679_p13, %p678_p6 }
  0x44   : > { %p681_p3 = pnand %p680_p7, %p674_p0 }
  0x46   : > { %684 = shalt.err (!%p681_p3)
}
  0x47   : > { %s759_s20 = smov 256   ;;  %s760_s23 = smov 128  }
  0x48   : > { %s761_s5 = smov 8   ;;  %p1012_p12 = scmp.ne.s32.totalorder %s1007_s29, 0 }
  0x49   : > { %567 = dma.hbm_to_vmem [thread:$0]  (!%p1011_p11), %s890_s22, 512, %s892_s13, %s894_s6, %s759_s20, %s760_s23, %s761_s5  }
  0x4a   : > { %214 = sbr.rel (%p1012_p12) target bundleno = 520 (0x208), region = 36  ;;  %p1013_p1 = scmp.eq.s32.totalorder (!%p1012_p12), %s810_s19, 0 }
  0x51   : > { %730 = dma.done.wait (%p1013_p1), [#allocation3], 16   ;;  %p1014_p8 = pmov %p1013_p1 }
  0x52   : > { %s929_s9 = sand.u32 1, %s747_s16   ;;  %p1015_p9 = scmp.ne.s32.totalorder %s1004_s26, 0 }
  0x53   : > { %732 = vsyncadd (%p1014_p8), [#allocation3], 4294967280  ;;  %s533_s25 = sshll.u32 %s929_s9, 5  ;;  %s221_s30 = scalar_lea.sflag [#allocation6], %s929_s9 }
  0x54   : > { %s224_s10 = scalar_lea.vmem [#allocation5], %s533_s25 }
  0x55   : > { %734 = dma.done.wait (%p1015_p9), %s221_s30, 512  }
  0x56   : > { %736 = vsyncadd (%p1015_p9), %s221_s30, 4294966784  ;;  %v762_v0 = vmov 0   ;;  %v613_v1 = vld [vmem:[%s224_s10 + $0x4] ss:$8 sps:$4 sm:$0xff]   ;;  %v615_v2 = vld [vmem:[%s224_s10] ss:$8 sps:$4 sm:$0xff]  }
  0x57   : > { %330 = vmatprep.mubr.bf16.mxu0 %v762_v0  ;;  %298 = vmatprep.subr.bf16.mxu0 %v613_v1  ;;  %v616_v3 = vld [vmem:[%s224_s10 + $0x14] ss:$8 sps:$4 sm:$0xff]   ;;  %v618_v4 = vld [vmem:[%s224_s10 + $0x10] ss:$8 sps:$4 sm:$0xff]   ;;  %vm294_vm0 = vcmask 261120   ;;  %vm339_vm1 = vcmask 1041408  }
  0x58   : > { %299 = vmatpush1.bf16.msra.mxu0 %v615_v2  ;;  %v269_v5 = vld [vmem:[#allocation2] sm:$0x1]  ;;  %s535_s26 = sshll.u32 %s810_s19, 1  ;;  %s534_s11 = sshll.u32 %s929_s9, 1 }
  0x59   : > { %300 = vmatprep.subr.bf16.mxu0 %v616_v3  ;;  %p259_p11 = scmp.lt.s32.totalorder %s535_s26, 3  ;;  %s548_s12 = sshll.u32 %s810_s19, 5 }
  0x5a   : > { %s256_s14 = scalar_lea.vmem [#allocation7], %s534_s11  ;;  %s949_s25 = scalar_lea.hbm %s997_s4, %s548_s12 }
  0x5b   : > { %s1024_s26 = smov (!%p259_p11, %s535_s26), 3  ;;  %s424_s20 = sshll.u32 %s256_s14, 4  ;;  %s951_s20 = int_to_ptr.vmem [resolvable:$true] %s424_s20 }
  0x5c   : > { %301 = vmatpush1.bf16.msra.mxu0 %v618_v4  ;;  %s261_s13 = scalar_lea.vmem %s995_s2, %s1024_s26  ;;  %s266_s7 = scalar_lea.vmem %s996_s3, %s1024_s26 }
  0x5d   : > { %v544_v27 = vld [vmem:[%s261_s13 + $0x1] ss:$0 sm:$0xff]  ;;  %v542_v40 = vld [vmem:[%s261_s13] ss:$0 sm:$0xff]  ;;  %s411_s30 = scalar_lea.sflag [#allocation4], %s929_s9  ;;  %s685_s10 = scalar_lea.vmem %s951_s20, 32 }
  0x5e   : > { %v545_v33 = vld [vmem:[%s266_s7 + $0x1] ss:$0 sm:$0xff]  ;;  %v543_v45 = vld [vmem:[%s266_s7] ss:$0 sm:$0xff]  ;;  %p686_p10 = scmp.ne.s32.totalorder %s951_s20, %s685_s10  ;;  %p1016_p2 = scmp.ne.s32.totalorder %s1005_s27, 0 }
  0x5f   : > { %541 = vmatmul.mubr.msk.bf16.vlgmr.msra.gmra.mrb[0].mxu0 %vm294_vm0, %v269_v5  ;;  %s763_s19 = smov [#allocation7]  }
  0x60   : > { %p687_p4 = pnand %p686_p10, %p1016_p2  ;;  %s689_s26 = sshll.u32 %s763_s19, 4  ;;  %s690_s26 = int_to_ptr.vmem [resolvable:$false] %s689_s26 }
  0x61   : > { %s691_s29 = scalar_lea.vmem %s690_s26, 64  ;;  %p692_p0 = scmp.lt.s32.totalorder %s951_s20, %s690_s26 }
  0x62   : > { %p688_p5 = pneg %p687_p4  ;;  %p693_p6 = scmp.lt.s32.totalorder %s691_s29, %s685_s10 }
  0x64   : > { %p694_p13 = por %p693_p6, %p692_p0 }
  0x66   : > { %p695_p7 = pnand %p694_p13, %p688_p5 }
 0x132   : > { %v332_v6 = vpop.f32.mrb[0].mxu0 }
 0x133   : > { %v334_v7 = vpop.f32.mrb[1].mxu0  ;;  %v340_v8 = vsel %vm339_vm1, %v332_v6, 0.0  ;;  %v343_v9 = vmul.f32 %v332_v6, %v332_v6 }
 0x134   : > { %341 = vadd.xlane.f32.xlu1 %v340_v8  ;;  %v336_v10 = vpop.f32.mrb[2].mxu0  ;;  %v353_v11 = vsel %vm339_vm1, %v334_v7, 0.0  ;;  %v356_v12 = vmul.f32 %v334_v7, %v334_v7 }
 0x135   : > { %354 = vadd.xlane.f32.xlu0 %v353_v11  ;;  %v337_v13 = vpop.f32.mrb[3].mxu0  ;;  %v344_v14 = vsel %vm339_vm1, %v343_v9, 0.0 }
 0x136   : > { %v357_v15 = vsel %vm339_vm1, %v356_v12, 0.0 }
 0x138   : > { %345 = vadd.xlane.f32.xlu1 %v344_v14 }
 0x139   : > { %358 = vadd.xlane.f32.xlu0 %v357_v15 }
 0x1c1   : > { %v342_v23 = vpop.xlane.xlu1 %341 }
 0x1c2   : > { %v355_v16 = vpop.xlane.xlu0 %354  ;;  %v347_v25 = vmul.f32 0.03125, %v342_v23 }
 0x1c3   : > { %v360_v17 = vmul.f32 0.03125, %v355_v16 }
 0x1c4   : > { %v349_v29 = vmul.f32 %v347_v25, %v347_v25  ;;  %v370_v43 = vsub.f32 %v332_v6, %v347_v25 }
 0x1c5   : > { %v362_v19 = vmul.f32 %v360_v17, %v360_v17  ;;  %v346_v24 = vpop.xlane.xlu1 %345  ;;  %v386_v30 = vsub.f32 %v334_v7, %v360_v17 }
 0x1c6   : > { %v359_v18 = vpop.xlane.xlu0 %358  ;;  %v348_v26 = vmul.f32 0.03125, %v346_v24 }
 0x1c7   : > { %v361_v20 = vmul.f32 0.03125, %v359_v18 }
 0x1c8   : > { %v350_v32 = vsub.f32 %v348_v26, %v349_v29 }
 0x1c9   : > { %v363_v21 = vsub.f32 %v361_v20, %v362_v19 }
 0x1ca   : > { %v351_v36 = vadd.f32 1e-05, %v350_v32 }
 0x1cb   : > { %v364_v22 = vadd.f32 1e-05, %v363_v21 }
 0x1cd   : > { %619 = vrsqrt.f32 %v364_v22 }
 0x1d7   : > { %v620_v28 = vpop.eup %619 }
 0x1d8   : > { %v393_v31 = vmul.f32 %v620_v28, %v544_v27 }
 0x1da   : > { %v394_v34 = vmul.f32 %v393_v31, %v386_v30 }
 0x1dc   : > { %v401_v35 = vadd.f32 %v545_v33, %v394_v34 }
 0x1de   : > { %v546_v37 = vmul.f32 -1.442695, %v401_v35 }
 0x1e0   : > { %621 = vpow2.f32 %v546_v37 }
 0x1e1   : > { %623 = vrsqrt.f32 %v351_v36 }
 0x1ea   : > { %v622_v38 = vpop.eup %621 }
 0x1eb   : > { %v624_v39 = vpop.eup %623  ;;  %v405_v41 = vadd.f32 1.0, %v622_v38 }
 0x1ec   : > { %v377_v42 = vmul.f32 %v624_v39, %v542_v40 }
 0x1ed   : > { %625 = vrcp.f32 %v405_v41 }
 0x1ee   : > { %v378_v44 = vmul.f32 %v377_v42, %v370_v43 }
 0x1f0   : > { %v385_v46 = vadd.f32 %v543_v45, %v378_v44 }
 0x1f7   : > { %v626_v47 = vpop.eup %625 }
 0x1f8   : > { %v408_v48 = vmul.f32 %v626_v47, %v385_v46 }
 0x1fa   : > { %409 = vst [vmem:[%s256_s14] sm:$0x3] %v408_v48 }
 0x1fb   : > { %698 = shalt.err (!%p695_p7)
}
 0x1fc   : > { %s699_s9 = scalar_lea.hbm %s949_s25, 32  ;;  %s703_s22 = scalar_lea.hbm %s997_s4, 64 }
 0x1fd   : > { %p700_p3 = scmp.ne.s32.totalorder %s949_s25, %s699_s9  ;;  %p704_p8 = scmp.lt.u32.totalorder %s949_s25, %s997_s4 }
 0x1fe   : > { %p705_p9 = scmp.lt.u32.totalorder %s703_s22, %s699_s9  ;;  %p707_p10 = scmp.lt.u32.totalorder %s699_s9, %s949_s25 }
 0x1ff   : > { %p701_p12 = pnand %p700_p3, %p1016_p2 }
 0x200   : > { %p706_p11 = por %p705_p9, %p704_p8 }
 0x201   : > { %p702_p1 = pneg %p701_p12 }
 0x202   : > { %p708_p4 = por %p707_p10, %p706_p11 }
 0x204   : > { %p709_p5 = pnand %p708_p4, %p702_p1 }
 0x206   : > { %712 = shalt.err (!%p709_p5)
}
 0x207   : > { %558 = dma.vmem_to_hbm [thread:$0]  (%p1016_p2), %s951_s20, 32, %s949_s25, %s411_s30  }
 0x208 PF: > { %s436_s11 = sand.u32 1, %s743_s15   ;;  %p1017_p0 = scmp.ne.s32.totalorder %s1006_s28, 0 }
 0x209   : > { %p1018_p6 = scmp.ge.s32.totalorder %s755_s18, 2  ;;  %s437_s12 = scalar_lea.sflag [#allocation4], %s436_s11 }
 0x20b   : > { %p569_p13 = pnand %p1018_p6, %p1017_p0 }
 0x20d   : > { %738 = dma.done.wait (!%p569_p13), %s437_s12, 32  }
 0x20e   : > { %740 = vsyncadd (!%p569_p13), %s437_s12, 4294967264  ;;  %p18_p7 = scmp.ge.s32.totalorder %s814_s21, 4   ;;  %s1019_s15 = smov %s747_s16 }
 0x20f   : > { %s1020_s16 = smov %s751_s17  ;;  %s1021_s17 = smov %s826_s24 }
 0x210   : > { %s1022_s18 = smov %s814_s21  ;;  %20 = sbr.rel (!%p18_p7) target bundleno = 6 (0x6), region = 92 }
 0x217   :  { %442 = vsyncpa [#allocation3], 1 }
 0x218   :  { %444 = vsyncpa [#allocation3 + $0x1], 1 }
 0x219   :  { %445 = vsyncpa [#allocation6], 1 }
 0x21a   :  { %447 = vsyncpa [#allocation6 + $0x1], 1 }
 0x21b   :  { %448 = vsyncpa [#allocation4], 1 }
 0x21c   :  { %450 = vsyncpa [#allocation4 + $0x1], 1 }

</bundles_post_ra>
